<compile_context>
chip_gen: v7x
topology: tpu7x:2x2x1
jax: 0.10.0
libtpu: 0.0.40
codegen_flags: <defaults>
</compile_context>

<pallas_src>
import jax
import jax.numpy as jnp
from jax.experimental import pallas as pl
from jax.experimental.pallas import tpu as pltpu


def _round_up(a: int, m: int) -> int:
    return (a + m - 1) // m * m


def policy_mlp_kernel(x_ref, w1_ref, b1_ref, w2_ref, b2_ref, o_ref):
    # x_ref:  (TM, D_in)      f32   (cast to bf16 in-kernel for the MXU)
    # w1_ref: (D_in, H)       bf16  b1_ref: (1, H)         f32
    # w2_ref: (H, D_out_pad)  bf16  b2_ref: (1, D_out_pad) f32 (-1e30 in pad cols)
    # o_ref:  (TM, D_out_pad) f32
    x = x_ref[...].astype(jnp.bfloat16)

    # hidden = relu(x @ W1 + b1)  -- MXU in bf16, f32 accumulation
    h = jnp.dot(x, w1_ref[...], preferred_element_type=jnp.float32)
    h = jnp.maximum(h + b1_ref[...], 0.0)

    # logits = h @ W2 + b2; padded columns get -1e30 via b2 (mask folded in).
    logits = jnp.dot(h.astype(jnp.bfloat16), w2_ref[...],
                     preferred_element_type=jnp.float32)
    logits = logits + b2_ref[...]

    # Numerically-stable softmax over the last dim (matches F.softmax(dim=-1)).
    m = jnp.max(logits, axis=-1, keepdims=True)
    e = jnp.exp(logits - m)          # exp(-1e30 - m) underflows to exactly 0
    denom = jnp.sum(e, axis=-1, keepdims=True)
    o_ref[...] = (e / denom).astype(o_ref.dtype)   # exact normalization


def prepare_params(w1_t, b1, w2_t, b2):
    """One-time parameter prep (call once at init, NOT per forward).

    Casts MXU operands to bf16, pads D_out to a lane-dense 128 multiple, and
    folds the padded-column softmax mask into b2 (-1e30 in padded columns;
    the padded W2 columns are zero, so padded logits equal exactly -1e30).
    """
    D_in, H = w1_t.shape
    D_out = w2_t.shape[1]
    D_out_pad = _round_up(D_out, 128)

    w1_p = w1_t.astype(jnp.bfloat16)                       # (D_in, H), no pad needed
    b1_p = b1.astype(jnp.float32).reshape(1, H)
    w2_p = jnp.zeros((H, D_out_pad), jnp.bfloat16)
    w2_p = w2_p.at[:, :D_out].set(w2_t.astype(jnp.bfloat16))
    b2_p = jnp.full((1, D_out_pad), -1e30, jnp.float32)
    b2_p = b2_p.at[:, :D_out].set(b2.astype(jnp.float32).reshape(1, D_out))
    return w1_p, b1_p, w2_p, b2_p, D_out


def policy_network_forward(x, w1_p, b1_p, w2_p, b2_p, d_out, *, block_m: int = 256):
    """x: [B, D_in] f32; remaining args come from prepare_params().

    block_m: batch tile. Default 256 collapses small batches to a single grid
    step (best on single-TC v5e/v6e). On v7x with large B, pass block_m so the
    grid step count is even (e.g. 128 at B=256) so both TensorCores get work.
    """
    B, D_in = x.shape
    H = w1_p.shape[1]
    D_out_pad = w2_p.shape[1]

    # Sublane-align the batch, then tile; only pad rows up to the tile size
    # actually used (single grid step for small batches).
    B8 = _round_up(B, 8)
    TM = min(block_m, B8)
    B_pad = _round_up(B8, TM)
    grid = (B_pad // TM,)

    if B_pad != B:
        x_in = jnp.zeros((B_pad, D_in), x.dtype).at[:B, :].set(x)
    else:
        x_in = x

    out_padded = pl.pallas_call(
        policy_mlp_kernel,
        out_shape=jax.ShapeDtypeStruct((B_pad, D_out_pad), jnp.float32),
        grid=grid,
        in_specs=[
            pl.BlockSpec((TM, D_in), lambda i: (i, 0)),     # x: tiled over batch
            pl.BlockSpec((D_in, H), lambda i: (0, 0)),      # W1: resident in VMEM
            pl.BlockSpec((1, H), lambda i: (0, 0)),         # b1: resident
            pl.BlockSpec((H, D_out_pad), lambda i: (0, 0)), # W2: resident
            pl.BlockSpec((1, D_out_pad), lambda i: (0, 0)), # b2 (+pad mask): resident
        ],
        out_specs=pl.BlockSpec((TM, D_out_pad), lambda i: (i, 0)),
        compiler_params=pltpu.CompilerParams(
            dimension_semantics=("parallel",)),             # 2-TC shard on v7x
    )(x_in, w1_p, b1_p, w2_p, b2_p)

    return out_padded[:B, :d_out]


def init_params(key, input_dim, output_dim, hidden=512):
    # Matches nn.init.uniform_(-c, c) with c = sqrt(1/input_dim) for all params.
    c = jnp.sqrt(1.0 / input_dim)
    k1, k2, k3, k4 = jax.random.split(key, 4)
    # PyTorch stores Linear weight as [out, in]; we keep the transposed [in, out]
    # layout so the kernel computes x @ W directly.
    w1_t = jax.random.uniform(k1, (input_dim, hidden), jnp.float32, -c, c)
    b1 = jax.random.uniform(k2, (hidden,), jnp.float32, -c, c)
    w2_t = jax.random.uniform(k3, (hidden, output_dim), jnp.float32, -c, c)
    b2 = jax.random.uniform(k4, (output_dim,), jnp.float32, -c, c)
    return w1_t, b1, w2_t, b2


if __name__ == "__main__":
    key = jax.random.PRNGKey(0)
    # Small shapes consistent with the module (hidden is fixed at 512).
    batch, input_dim, output_dim, hidden = 16, 32, 8, 512

    kx, kp = jax.random.split(key)
    x = jax.random.normal(kx, (batch, input_dim), jnp.float32)
    w1_t, b1, w2_t, b2 = init_params(kp, input_dim, output_dim, hidden)

    # One-time param prep (hoisted out of the forward path).
    w1_p, b1_p, w2_p, b2_p, d_out = prepare_params(w1_t, b1, w2_t, b2)

    out = policy_network_forward(x, w1_p, b1_p, w2_p, b2_p, d_out)
    out = jax.block_until_ready(out)
    assert out.shape == (batch, output_dim)

    # Reference with matching bf16 MXU operand precision (f32 accumulation).
    h_ref = jnp.maximum(
        jnp.dot(x.astype(jnp.bfloat16), w1_t.astype(jnp.bfloat16),
                preferred_element_type=jnp.float32) + b1[None, :], 0.0)
    logits_ref = jnp.dot(h_ref.astype(jnp.bfloat16), w2_t.astype(jnp.bfloat16),
                         preferred_element_type=jnp.float32) + b2[None, :]
    ref = jax.nn.softmax(logits_ref, axis=-1)

    assert jnp.allclose(out, ref, atol=2e-3, rtol=2e-3), \
        f"max abs err {jnp.max(jnp.abs(out - ref))}"
    # Exact (non-approx) normalization: rows sum to 1 to f32 rounding.
    assert jnp.allclose(jnp.sum(out, axis=-1), 1.0, atol=1e-5)

    # Looser sanity check against the pure-f32 math (bf16 operand deviation
    # from PyTorch's f32 nn.Linear is intentional; see notes).
    h32 = jnp.maximum(x @ w1_t + b1[None, :], 0.0)
    ref32 = jax.nn.softmax(h32 @ w2_t + b2[None, :], axis=-1)
    assert jnp.allclose(out, ref32, atol=5e-2, rtol=5e-2)

    print("KERNEL_OK")
</pallas_src>

<mosaic_0001>
module attributes {stable_mosaic.version = 11 : i64} {
  func.func @policy_mlp_kernel(%arg0: i32, %arg1: memref<16x32xf32, #tpu.memory_space<vmem>>, %arg2: memref<32x512xbf16, #tpu.memory_space<vmem>>, %arg3: memref<1x512xf32, #tpu.memory_space<vmem>>, %arg4: memref<512x128xbf16, #tpu.memory_space<vmem>>, %arg5: memref<1x128xf32, #tpu.memory_space<vmem>>, %arg6: memref<16x128xf32, #tpu.memory_space<vmem>>) attributes {dimension_semantics = [#tpu.dimension_semantics<parallel>], iteration_bounds = array<i64: 1>, scalar_prefetch = 0 : i64, scratch_operands = 0 : i64, tpu.core_type = #tpu.core_type<tc>, window_params = [{transform_indices = @transform_0, window_bounds = array<i64: 16, 32>}, {pipeline_mode = #tpu.pipeline_mode<synchronous>, transform_indices = @transform_1, window_bounds = array<i64: 32, 512>}, {pipeline_mode = #tpu.pipeline_mode<synchronous>, transform_indices = @transform_2, window_bounds = array<i64: 1, 512>}, {pipeline_mode = #tpu.pipeline_mode<synchronous>, transform_indices = @transform_3, window_bounds = array<i64: 512, 128>}, {pipeline_mode = #tpu.pipeline_mode<synchronous>, transform_indices = @transform_4, window_bounds = array<i64: 1, 128>}, {transform_indices = @transform_5, window_bounds = array<i64: 16, 128>}]} {
    %c0 = arith.constant 0 : index
    %c0_0 = arith.constant 0 : index
    %0 = vector.load %arg1[%c0, %c0_0] : memref<16x32xf32, #tpu.memory_space<vmem>>, vector<16x32xf32>
    %1 = arith.truncf %0 : vector<16x32xf32> to vector<16x32xbf16>
    %c0_1 = arith.constant 0 : index
    %c0_2 = arith.constant 0 : index
    %2 = vector.load %arg2[%c0_1, %c0_2] : memref<32x512xbf16, #tpu.memory_space<vmem>>, vector<32x512xbf16>
    %cst = arith.constant dense<0.000000e+00> : vector<16x512xf32>
    %3 = tpu.matmul %1, %2, %cst {dimension_numbers = #tpu.dot_dimension_numbers<[1], [0], [0], [1], [0, 0, 1, 1], [], []>} : vector<16x32xbf16>, vector<32x512xbf16>, vector<16x512xf32> -> vector<16x512xf32>
    %c0_3 = arith.constant 0 : index
    %c0_4 = arith.constant 0 : index
    %4 = vector.load %arg3[%c0_3, %c0_4] : memref<1x512xf32, #tpu.memory_space<vmem>>, vector<1x512xf32>
    %5 = vector.broadcast %4 : vector<1x512xf32> to vector<16x512xf32>
    %6 = arith.addf %3, %5 : vector<16x512xf32>
    %cst_5 = arith.constant 0.000000e+00 : f32
    %7 = vector.broadcast %cst_5 : f32 to vector<16x512xf32>
    %8 = arith.maximumf %6, %7 : vector<16x512xf32>
    %9 = arith.truncf %8 : vector<16x512xf32> to vector<16x512xbf16>
    %c0_6 = arith.constant 0 : index
    %c0_7 = arith.constant 0 : index
    %10 = vector.load %arg4[%c0_6, %c0_7] : memref<512x128xbf16, #tpu.memory_space<vmem>>, vector<512x128xbf16>
    %cst_8 = arith.constant dense<0.000000e+00> : vector<16x128xf32>
    %11 = tpu.matmul %9, %10, %cst_8 {dimension_numbers = #tpu.dot_dimension_numbers<[1], [0], [0], [1], [0, 0, 1, 1], [], []>} : vector<16x512xbf16>, vector<512x128xbf16>, vector<16x128xf32> -> vector<16x128xf32>
    %c0_9 = arith.constant 0 : index
    %c0_10 = arith.constant 0 : index
    %12 = vector.load %arg5[%c0_9, %c0_10] : memref<1x128xf32, #tpu.memory_space<vmem>>, vector<1x128xf32>
    %13 = vector.broadcast %12 : vector<1x128xf32> to vector<16x128xf32>
    %14 = arith.addf %11, %13 : vector<16x128xf32>
    %cst_11 = arith.constant dense<0xFF800000> : vector<16xf32>
    %15 = vector.multi_reduction <maximumf>, %14, %cst_11 [1] : vector<16x128xf32> to vector<16xf32>
    %16 = vector.shape_cast %15 : vector<16xf32> to vector<16x1xf32>
    %17 = vector.broadcast %16 : vector<16x1xf32> to vector<16x128xf32>
    %18 = arith.subf %14, %17 : vector<16x128xf32>
    %19 = math.exp %18 : vector<16x128xf32>
    %cst_12 = arith.constant dense<0.000000e+00> : vector<16xf32>
    %20 = vector.multi_reduction <add>, %19, %cst_12 [1] : vector<16x128xf32> to vector<16xf32>
    %21 = vector.shape_cast %20 : vector<16xf32> to vector<16x1xf32>
    %22 = vector.broadcast %21 : vector<16x1xf32> to vector<16x128xf32>
    %23 = arith.divf %19, %22 : vector<16x128xf32>
    %c0_13 = arith.constant 0 : index
    %c0_14 = arith.constant 0 : index
    %24 = vector.load %arg6[%c0_13, %c0_14] : memref<16x128xf32, #tpu.memory_space<vmem>>, vector<16x128xf32>
    tpu.vector_store %arg6[%c0_13, %c0_14], %23 {strides = array<i32>} : memref<16x128xf32, #tpu.memory_space<vmem>>, vector<16x128xf32>,
    return
  }
  func.func @transform_0(%arg0: i32) -> (i32, i32) {
    %c0_i32 = arith.constant 0 : i32
    %c0_i32_0 = arith.constant 0 : i32
    return %arg0, %c0_i32 : i32, i32
  }
  func.func @transform_1(%arg0: i32) -> (i32, i32) {
    %c0_i32 = arith.constant 0 : i32
    %c0_i32_0 = arith.constant 0 : i32
    %c0_i32_1 = arith.constant 0 : i32
    return %c0_i32, %c0_i32_0 : i32, i32
  }
  func.func @transform_2(%arg0: i32) -> (i32, i32) {
    %c0_i32 = arith.constant 0 : i32
    %c0_i32_0 = arith.constant 0 : i32
    %c0_i32_1 = arith.constant 0 : i32
    return %c0_i32, %c0_i32_0 : i32, i32
  }
  func.func @transform_3(%arg0: i32) -> (i32, i32) {
    %c0_i32 = arith.constant 0 : i32
    %c0_i32_0 = arith.constant 0 : i32
    %c0_i32_1 = arith.constant 0 : i32
    return %c0_i32, %c0_i32_0 : i32, i32
  }
  func.func @transform_4(%arg0: i32) -> (i32, i32) {
    %c0_i32 = arith.constant 0 : i32
    %c0_i32_0 = arith.constant 0 : i32
    %c0_i32_1 = arith.constant 0 : i32
    return %c0_i32, %c0_i32_0 : i32, i32
  }
  func.func @transform_5(%arg0: i32) -> (i32, i32) {
    %c0_i32 = arith.constant 0 : i32
    %c0_i32_0 = arith.constant 0 : i32
    return %arg0, %c0_i32 : i32, i32
  }
}

</mosaic_0001>

<bundles_post_ra>
// kernel: tpu_custom_call.1
= control target key start
LH: loop header
LB: loop body
LE: loop exit
PB: predicated region body
PF: predicated region fallthrough
CT: control target
= control target key end

     0   :  { %10 = vsyncpa [#allocation3], 0  ;;  %s966_s0 = inlined_call_operand.hbm [shape: f32[16,32], index: 0, kind: input, shape index: {}]   ;;  %s967_s1 = inlined_call_operand.hbm [shape: bf16[32,512], index: 1, kind: input, shape index: {}]   ;;  %s968_s2 = inlined_call_operand.vmem [shape: f32[1,512], index: 2, kind: input, shape index: {}]   ;;  %s969_s3 = inlined_call_operand.hbm [shape: bf16[512,128], index: 3, kind: input, shape index: {}]   ;;  %s970_s4 = inlined_call_operand.vmem [shape: f32[1,128], index: 4, kind: input, shape index: {}]   ;;  %s971_s5 = inlined_call_operand.hbm [shape: f32[16,128], index: 5, kind: output, shape index: {}]  }
   0x1   :  { %11 = vsyncpa [#allocation6], 0 }
   0x2   :  { %12 = vsyncpa [#allocation4], 0  ;;  %s865_s18 = smov [#allocation5]   ;;  %s771_s22 = scalar_lea.hbm %s967_s1, 1024 }
   0x3   :  { %s30_s19 = sshll.u32 %s865_s18, 4  ;;  %p772_p0 = scmp.ne.s32.totalorder %s967_s1, %s771_s22  ;;  %s31_s19 = int_to_ptr.vmem [resolvable:$true] %s30_s19 }
   0x4   :  { %p775_p1 = scmp.lt.u32.totalorder %s771_s22, %s967_s1 }
   0x6   :  { %p777_p2 = pnand %p775_p1, %p772_p0 }
   0x8   :  { %780 = shalt.err (!%p777_p2)
}
   0x9   :  { %s781_s27 = scalar_lea.vmem %s31_s19, 1024  ;;  %p786_p4 = scmp.lt.s32.totalorder %s31_s19, %s31_s19 }
   0xa   :  { %p782_p3 = scmp.ne.s32.totalorder %s31_s19, %s781_s27  ;;  %p787_p5 = scmp.lt.s32.totalorder %s781_s27, %s781_s27 }
   0xc   :  { %p788_p6 = por %p787_p5, %p786_p4 }
   0xe   :  { %p789_p7 = pnand %p788_p6, %p782_p3 }
  0x10   :  { %792 = shalt.err (!%p789_p7)
}
  0x11   :  { %s866_s28 = smov 256   ;;  %s867_s29 = smov 16  }
  0x12   :  { %36 = dma.hbm_to_vmem [thread:$0]  %s967_s1, 1024, %s31_s19, [#allocation6], %s866_s28, %s866_s28, %s867_s29  }
  0x13   :  { %s868_s7 = smov [#allocation2]   ;;  %s793_s11 = scalar_lea.hbm %s966_s0, 256 }
  0x14   :  { %s18_s8 = sshll.u32 %s868_s7, 4  ;;  %p794_p8 = scmp.ne.s32.totalorder %s966_s0, %s793_s11  ;;  %s19_s8 = int_to_ptr.vmem [resolvable:$true] %s18_s8 }
  0x15   :  { %p797_p9 = scmp.lt.u32.totalorder %s793_s11, %s966_s0 }
  0x17   :  { %p799_p10 = pnand %p797_p9, %p794_p8 }
  0x19   :  { %802 = shalt.err (!%p799_p10)
}
  0x1a   :  { %s803_s16 = scalar_lea.vmem %s19_s8, 256  ;;  %p808_p12 = scmp.lt.s32.totalorder %s19_s8, %s19_s8 }
  0x1b   :  { %p804_p11 = scmp.ne.s32.totalorder %s19_s8, %s803_s16  ;;  %p809_p13 = scmp.lt.s32.totalorder %s803_s16, %s803_s16 }
  0x1d   :  { %p810_p0 = por %p809_p13, %p808_p12 }
  0x1f   :  { %p811_p1 = pnand %p810_p0, %p804_p11 }
  0x21   :  { %814 = shalt.err (!%p811_p1)
}
  0x22   :  { %s869_s1 = smov 128   ;;  %s870_s17 = smov 8  }
  0x23   :  { %24 = dma.hbm_to_vmem [thread:$0]  %s966_s0, 256, %s19_s8, [#allocation3], %s869_s1, %s869_s1, %s870_s17  }
  0x24   :  { %s871_s20 = smov [#allocation7]   ;;  %s815_s24 = scalar_lea.hbm %s969_s3, 4096 }
  0x25   :  { %s44_s21 = sshll.u32 %s871_s20, 4  ;;  %p816_p2 = scmp.ne.s32.totalorder %s969_s3, %s815_s24  ;;  %s45_s21 = int_to_ptr.vmem [resolvable:$true] %s44_s21 }
  0x26   :  { %p819_p3 = scmp.lt.u32.totalorder %s815_s24, %s969_s3 }
  0x28   :  { %p821_p4 = pnand %p819_p3, %p816_p2 }
  0x2a   :  { %824 = shalt.err (!%p821_p4)
}
  0x2b   :  { %s825_s29 = scalar_lea.vmem %s45_s21, 4096  ;;  %p830_p6 = scmp.lt.s32.totalorder %s45_s21, %s45_s21 }
  0x2c   :  { %p826_p5 = scmp.ne.s32.totalorder %s45_s21, %s825_s29  ;;  %p831_p7 = scmp.lt.s32.totalorder %s825_s29, %s825_s29 }
  0x2e   :  { %p832_p8 = por %p831_p7, %p830_p6 }
  0x30   :  { %p833_p9 = pnand %p832_p8, %p826_p5 }
  0x32   :  { %836 = shalt.err (!%p833_p9)
}
  0x33   :  { %s872_s0 = smov 64   ;;  %s873_s30 = smov 4  }
  0x34   :  { %50 = dma.hbm_to_vmem [thread:$0]  %s969_s3, 4096, %s45_s21, [#allocation6], %s872_s0, %s872_s0, %s873_s30  }
  0x35   :  { %859 = dma.done.wait [#allocation3], 256  }
  0x36   :  { %860 = vsyncadd [#allocation3], 4294967040 }
  0x37   :  { %861 = dma.done.wait [#allocation6], 5120  }
  0x38   :  { %862 = vsyncadd [#allocation6], 4294962176  ;;  %v874_v0 = vmov 0   ;;  %v719_v1 = vld [vmem:[#allocation5 + $0x4] ss:$16 sps:$4 sm:$0xff]   ;;  %v64_v10 = vld [vmem:[#allocation2 + $0x8] sm:$0xff]  ;;  %v76_v44 = vlaneseq }
  0x39   :  { %172 = vmatprep.mubr.bf16.mxu0 %v874_v0  ;;  %215 = vmatprep.mubr.bf16.mxu1 %v874_v0  ;;  %v721_v2 = vld [vmem:[#allocation5 + $0xc] ss:$16 sps:$4 sm:$0xff]   ;;  %v723_v3 = vld [vmem:[#allocation5] ss:$16 sps:$4 sm:$0xff]   ;;  %v724_v4 = vld [vmem:[#allocation5 + $0x8] ss:$16 sps:$4 sm:$0xff]  }
  0x3a   :  { %140 = vmatprep.subr.bf16.mxu0 %v719_v1  ;;  %183 = vmatprep.subr.bf16.mxu1 %v721_v2  ;;  %v725_v5 = vld [vmem:[#allocation5 + $0x24] ss:$16 sps:$4 sm:$0xff]   ;;  %v727_v6 = vld [vmem:[#allocation5 + $0x2c] ss:$16 sps:$4 sm:$0xff]   ;;  %v729_v7 = vld [vmem:[#allocation5 + $0x20] ss:$16 sps:$4 sm:$0xff]  }
  0x3b   :  { %141 = vmatpush1.bf16.msra.mxu0 %v723_v3  ;;  %184 = vmatpush1.bf16.msra.mxu1 %v724_v4  ;;  %v730_v8 = vld [vmem:[#allocation5 + $0x28] ss:$16 sps:$4 sm:$0xff]   ;;  %v63_v9 = vld [vmem:[#allocation2] sm:$0xff]  ;;  %v731_v11 = vld [vmem:[#allocation7 + $0x40] sm:$0xff]   ;;  %vm136_vm0 = vcmask 261120   ;;  %v77_v45 = vshrl.u32 %v76_v44, 7 }
  0x3c   :  { %142 = vmatprep.subr.bf16.mxu0 %v725_v5  ;;  %185 = vmatprep.subr.bf16.mxu1 %v727_v6  ;;  %v65_v12 = vpack.c.bf16 %v64_v10, %v63_v9  ;;  %v732_v13 = vld [vmem:[#allocation7 + $0xc0] sm:$0xff]   ;;  %v735_v16 = vld [vmem:[#allocation7 + $0x48] sm:$0xff]   ;;  %v739_v20 = vld [vmem:[#allocation7 + $0x50] sm:$0xff]  }
  0x3d   :  { %v733_v14 = vld [vmem:[#allocation7] sm:$0xff]   ;;  %v736_v17 = vld [vmem:[#allocation7 + $0xc8] sm:$0xff]   ;;  %v740_v21 = vld [vmem:[#allocation7 + $0xd0] sm:$0xff]   ;;  %v78_v46 = vsub.s32 0, %v77_v45  ;;  %v86_v47 = vsub.s32 2, %v77_v45  ;;  %v82_v49 = vsub.s32 1, %v77_v45 }
  0x3e   :  { %v734_v15 = vld [vmem:[#allocation7 + $0x80] sm:$0xff]   ;;  %v737_v18 = vld [vmem:[#allocation7 + $0x8] sm:$0xff]   ;;  %v741_v22 = vld [vmem:[#allocation7 + $0x10] sm:$0xff]   ;;  %v90_v50 = vsub.s32 3, %v77_v45 }
  0x3f   :  { %143 = vmatpush1.bf16.msra.mxu0 %v729_v7  ;;  %186 = vmatpush1.bf16.msra.mxu1 %v730_v8  ;;  %v738_v19 = vld [vmem:[#allocation7 + $0x88] sm:$0xff]   ;;  %v742_v23 = vld [vmem:[#allocation7 + $0x90] sm:$0xff]   ;;  %v743_v24 = vld [vmem:[#allocation7 + $0x58] sm:$0xff]  }
  0x40   :  { %664 = vmatprep.subr.bf16.mxu0 %v731_v11  ;;  %686 = vmatprep.subr.bf16.mxu1 %v732_v13  ;;  %v744_v25 = vld [vmem:[#allocation7 + $0xd8] sm:$0xff]   ;;  %v747_v28 = vld [vmem:[#allocation7 + $0x60] sm:$0xff]   ;;  %v751_v32 = vld [vmem:[#allocation7 + $0x68] sm:$0xff]  }
  0x41   :  { %v745_v26 = vld [vmem:[#allocation7 + $0x18] sm:$0xff]   ;;  %v748_v29 = vld [vmem:[#allocation7 + $0xe0] sm:$0xff]   ;;  %v752_v33 = vld [vmem:[#allocation7 + $0xe8] sm:$0xff]  }
  0x42   :  { %629 = vmatmul.mubr.msk.bf16.vlgmr.msra.gmra.mrb[0].mxu0 %vm136_vm0, %v65_v12  ;;  %630 = vmatmul.mubr.msk.bf16.vlgmr.msra.gmra.mrb[0].mxu1 %vm136_vm0, %v65_v12  ;;  %v746_v27 = vld [vmem:[#allocation7 + $0x98] sm:$0xff]   ;;  %v749_v30 = vld [vmem:[#allocation7 + $0x20] sm:$0xff]   ;;  %v753_v34 = vld [vmem:[#allocation7 + $0x28] sm:$0xff]  }
  0x43   :  { %665 = vmatpush3.bf16.msra.mxu0 %v733_v14  ;;  %687 = vmatpush3.bf16.msra.mxu1 %v734_v15  ;;  %v750_v31 = vld [vmem:[#allocation7 + $0xa0] sm:$0xff]   ;;  %v754_v35 = vld [vmem:[#allocation7 + $0xa8] sm:$0xff]   ;;  %v755_v36 = vld [vmem:[#allocation7 + $0x70] sm:$0xff]  }
  0x44   :  { %666 = vmatprep.subr.bf16.mxu0 %v735_v16  ;;  %688 = vmatprep.subr.bf16.mxu1 %v736_v17  ;;  %v756_v37 = vld [vmem:[#allocation7 + $0xf0] sm:$0xff]   ;;  %v759_v40 = vld [vmem:[#allocation7 + $0x78] sm:$0xff]  }
  0x45   :  { %v757_v38 = vld [vmem:[#allocation7 + $0x30] sm:$0xff]   ;;  %v760_v41 = vld [vmem:[#allocation7 + $0xf8] sm:$0xff]  }
  0x46   :  { %v758_v39 = vld [vmem:[#allocation7 + $0xb0] sm:$0xff]   ;;  %v761_v42 = vld [vmem:[#allocation7 + $0x38] sm:$0xff]  }
  0x47   :  { %667 = vmatpush3.bf16.msra.mxu0 %v737_v18  ;;  %689 = vmatpush3.bf16.msra.mxu1 %v738_v19  ;;  %v762_v43 = vld [vmem:[#allocation7 + $0xb8] sm:$0xff]   ;;  %v74_v48 = vld [vmem:[%s968_s2] sm:$0xf] }
  0x48   :  { %668 = vmatprep.subr.bf16.mxu0 %v739_v20  ;;  %690 = vmatprep.subr.bf16.mxu1 %v740_v21  ;;  %v79_v51 = vrot.slane %v74_v48, %v78_v46  ;;  %v87_v52 = vrot.slane %v74_v48, %v86_v47  ;;  %v83_v53 = vrot.slane %v74_v48, %v82_v49  ;;  %v631_v21 = vld [vmem:[%s970_s4] ss:$0 sm:$0xff]  ;;  %s875_s4 = smov [#allocation8]  }
  0x49   :  { %v91_v54 = vrot.slane %v74_v48, %v90_v50  ;;  %s608_s10 = sshll.u32 %s875_s4, 4  ;;  %s609_s10 = int_to_ptr.vmem [resolvable:$true] %s608_s10 }
  0x4a   :  { %s837_s11 = scalar_lea.vmem %s609_s10, 256  ;;  %p842_p11 = scmp.lt.s32.totalorder %s609_s10, %s609_s10 }
  0x4b   :  { %669 = vmatpush3.bf16.msra.mxu0 %v741_v22  ;;  %691 = vmatpush3.bf16.msra.mxu1 %v742_v23  ;;  %p838_p10 = scmp.ne.s32.totalorder %s609_s10, %s837_s11  ;;  %p843_p12 = scmp.lt.s32.totalorder %s837_s11, %s837_s11 }
  0x4c   :  { %670 = vmatprep.subr.bf16.mxu0 %v743_v24  ;;  %692 = vmatprep.subr.bf16.mxu1 %v744_v25 }
  0x4d   :  { %p844_p13 = por %p843_p12, %p842_p11 }
  0x4f   :  { %671 = vmatpush3.bf16.msra.mxu0 %v745_v26  ;;  %693 = vmatpush3.bf16.msra.mxu1 %v746_v27  ;;  %p845_p0 = pnand %p844_p13, %p838_p10 }
  0x50   :  { %672 = vmatprep.subr.bf16.mxu0 %v747_v28  ;;  %694 = vmatprep.subr.bf16.mxu1 %v748_v29 }
  0x53   :  { %673 = vmatpush3.bf16.msra.mxu0 %v749_v30  ;;  %695 = vmatpush3.bf16.msra.mxu1 %v750_v31 }
  0x54   :  { %674 = vmatprep.subr.bf16.mxu0 %v751_v32  ;;  %696 = vmatprep.subr.bf16.mxu1 %v752_v33 }
  0x57   :  { %675 = vmatpush3.bf16.msra.mxu0 %v753_v34  ;;  %697 = vmatpush3.bf16.msra.mxu1 %v754_v35 }
  0x58   :  { %676 = vmatprep.subr.bf16.mxu0 %v755_v36  ;;  %698 = vmatprep.subr.bf16.mxu1 %v756_v37 }
  0x5b   :  { %677 = vmatpush3.bf16.msra.mxu0 %v757_v38  ;;  %699 = vmatpush3.bf16.msra.mxu1 %v758_v39 }
  0x5c   :  { %678 = vmatprep.subr.bf16.mxu0 %v759_v40  ;;  %700 = vmatprep.subr.bf16.mxu1 %v760_v41 }
  0x5f   :  { %679 = vmatpush3.bf16.msra.mxu0 %v761_v42  ;;  %701 = vmatpush3.bf16.msra.mxu1 %v762_v43 }
 0x115   :  { %v174_v55 = vpop.f32.mrb[0].mxu0  ;;  %v217_v56 = vpop.f32.mrb[0].mxu1 }
 0x116   :  { %v175_v57 = vadd.f32 %v174_v55, %v79_v51  ;;  %v218_v58 = vadd.f32 %v217_v56, %v87_v52  ;;  %v176_v59 = vpop.f32.mrb[1].mxu0  ;;  %v219_v60 = vpop.f32.mrb[1].mxu1 }
 0x117   :  { %v177_v61 = vadd.f32 %v176_v59, %v83_v53  ;;  %v220_v62 = vadd.f32 %v219_v60, %v91_v54  ;;  %v178_v63 = vpop.f32.mrb[2].mxu0  ;;  %v221_v0 = vpop.f32.mrb[2].mxu1 }
 0x118   :  { %v228_v1 = vmax.f32 %v218_v58, 0.0  ;;  %v179_v2 = vadd.f32 %v178_v63, %v79_v51  ;;  %v222_v3 = vadd.f32 %v221_v0, %v87_v52  ;;  %v180_v4 = vpop.f32.mrb[3].mxu0  ;;  %v223_v5 = vpop.f32.mrb[3].mxu1  ;;  %v226_v9 = vmax.f32 %v175_v57, 0.0 }
 0x119   :  { %v229_v6 = vmax.f32 %v220_v62, 0.0  ;;  %v181_v7 = vadd.f32 %v180_v4, %v83_v53  ;;  %v224_v8 = vadd.f32 %v223_v5, %v91_v54  ;;  %v227_v12 = vmax.f32 %v177_v61, 0.0 }
 0x11a   :  { %v230_v10 = vmax.f32 %v179_v2, 0.0  ;;  %v232_v11 = vmax.f32 %v222_v3, 0.0 }
 0x11b   :  { %v231_v13 = vmax.f32 %v181_v7, 0.0  ;;  %v233_v14 = vmax.f32 %v224_v8, 0.0 }
 0x11c   :  { %v234_v15 = vpack.c.bf16 %v230_v10, %v226_v9  ;;  %v236_v16 = vpack.c.bf16 %v232_v11, %v228_v1 }
 0x11d   :  { %v235_v17 = vpack.c.bf16 %v231_v13, %v227_v12  ;;  %v237_v18 = vpack.c.bf16 %v233_v14, %v229_v6 }
 0x11f   :  { %533 = vmatprep.mubr.bf16.mxu0 %v235_v17  ;;  %574 = vmatprep.mubr.bf16.mxu1 %v237_v18 }
 0x120   :  { %534 = vmatmul.mubr.bf16.vlgmr.msra.gmra.mrb[4].mxu0 %v234_v15  ;;  %575 = vmatmul.mubr.bf16.vlgmr.msra.gmra.mrb[4].mxu1 %v236_v16 }
 0x1f3   :  { %v680_v19 = vpop.f32.mrb[4].mxu0  ;;  %v702_v20 = vpop.f32.mrb[4].mxu1 }
 0x1f4   :  { %v681_v22 = vpop.f32.mrb[5].mxu0  ;;  %v703_v23 = vpop.f32.mrb[5].mxu1 }
 0x1f5   :  { %v682_v24 = vadd.f32 %v681_v22, %v680_v19  ;;  %v704_v25 = vadd.f32 %v703_v23, %v702_v20  ;;  %v683_v26 = vpop.f32.mrb[6].mxu0  ;;  %v705_v27 = vpop.f32.mrb[6].mxu1 }
 0x1f6   :  { %v684_v28 = vpop.f32.mrb[7].mxu0  ;;  %v706_v29 = vpop.f32.mrb[7].mxu1 }
 0x1f7   :  { %v536_v30 = vadd.f32 %v682_v24, %v631_v21  ;;  %v685_v31 = vadd.f32 %v684_v28, %v683_v26  ;;  %v707_v32 = vadd.f32 %v706_v29, %v705_v27 }
 0x1f9   :  { %v539_v33 = vadd.f32 %v685_v31, %v631_v21  ;;  %v577_v34 = vadd.f32 %v704_v25, %v536_v30 }
 0x1fb   :  { %583 = vmax.xlane.f32.xlu0 %v577_v34  ;;  %v580_v35 = vadd.f32 %v707_v32, %v539_v33 }
 0x1ff   :  { %585 = vmax.xlane.f32.xlu0 %v580_v35 }
 0x288   :  { %v584_v36 = vpop.xlane.xlu0 %583 }
 0x289   :  { %v587_v37 = vsub.f32 %v577_v34, %v584_v36 }
 0x28b   :  { %v589_v38 = vmul.f32 1.442695, %v587_v37 }
 0x28c   :  { %v586_v39 = vpop.xlane.xlu0 %585 }
 0x28d   :  { %763 = vpow2.f32 %v589_v38  ;;  %v588_v40 = vsub.f32 %v580_v35, %v586_v39 }
 0x28f   :  { %v591_v41 = vmul.f32 1.442695, %v588_v40 }
 0x291   :  { %765 = vpow2.f32 %v591_v41 }
 0x297   :  { %v764_v42 = vpop.eup %763 }
 0x298   :  { %593 = vadd.xlane.f32.xlu1 %v764_v42 }
 0x29b   :  { %v766_v43 = vpop.eup %765 }
 0x29c   :  { %595 = vadd.xlane.f32.xlu1 %v766_v43 }
 0x325   :  { %v594_v44 = vpop.xlane.xlu1 %593 }
 0x326   :  { %767 = vrcp.f32 %v594_v44 }
 0x329   :  { %v596_v45 = vpop.xlane.xlu1 %595 }
 0x32a   :  { %769 = vrcp.f32 %v596_v45 }
 0x330   :  { %v768_v46 = vpop.eup %767 }
 0x331   :  { %v598_v47 = vmul.f32 %v768_v46, %v764_v42 }
 0x333   :  { %601 = vst [vmem:[#allocation8] sm:$0xff] %v598_v47 }
 0x334   :  { %v770_v48 = vpop.eup %769 }
 0x335   :  { %v600_v49 = vmul.f32 %v770_v48, %v766_v43 }
 0x337   :  { %602 = vst [vmem:[#allocation8 + $0x8] sm:$0xff] %v600_v49 }
 0x338   :  { %848 = shalt.err (!%p845_p0)
}
 0x339   :  { %s849_s14 = scalar_lea.hbm %s971_s5, 256 }
 0x33a   :  { %p850_p1 = scmp.ne.s32.totalorder %s971_s5, %s849_s14  ;;  %p853_p2 = scmp.lt.u32.totalorder %s849_s14, %s971_s5 }
 0x33c   :  { %p855_p3 = pnand %p853_p2, %p850_p1 }
 0x33e   :  { %858 = shalt.err (!%p855_p3)
}
 0x33f   :  { %614 = dma.vmem_to_hbm [thread:$0]  %s609_s10, 256, %s971_s5, [#allocation4], %s869_s1, %s869_s1, %s870_s17  }
 0x340   :  { %863 = dma.done.wait [#allocation4], 256  }
 0x341   :  { %864 = vsyncadd [#allocation4], 4294967040 }
 0x342   :  { %618 = vsyncpa [#allocation3], 1 }
 0x343   :  { %619 = vsyncpa [#allocation6], 1 }
 0x344   :  { %620 = vsyncpa [#allocation4], 1 }

</bundles_post_ra>
